<compile_context>
chip_gen: v5e
topology: v5e:2x2
jax: 0.10.0
libtpu: 0.0.40
codegen_flags: <defaults>
</compile_context>

<pallas_src>
import jax
import jax.numpy as jnp
from jax.experimental import pallas as pl
from jax.experimental.pallas import tpu as pltpu

# 8-bit unsigned bit_type (typical for activations)
QMIN = 0.0
QMAX = 255.0

LANE = 128
SUBLANE = 8
# ~2 MiB of f32 per input block: double-buffered input + output blocks stay
# around ~8 MiB of VMEM (safe on v5e's 16 MiB default scoped limit and v7x's
# 64 MiB physical VMEM) while being large enough to amortize the ~0.35 us
# per-grid-step overhead of this purely HBM-bound elementwise op.
_TARGET_BLOCK_ELEMS = 512 * 1024
_MAX_TILE_COLS = (_TARGET_BLOCK_ELEMS // SUBLANE) // LANE * LANE  # 65536


def _round_up(x, m):
    return (x + m - 1) // m * m


def _fake_quant_kernel(x_ref, params_ref, o_ref):
    x = x_ref[...].astype(jnp.float32)      # (tile_rows, tile_cols)
    scale = params_ref[:, 0:1]              # (tile_rows, 1) f32
    zp = params_ref[:, 1:2]                 # (tile_rows, 1) f32
    # quant: divide (matches reference bit-for-bit), round-half-to-even
    # (matches torch.round), clamp to the bit range.
    q = jnp.clip(jnp.round(x / scale + zp), QMIN, QMAX)
    # dequantize
    o_ref[...] = ((q - zp) * scale).astype(o_ref.dtype)


def _choose_tiles(rows, cols):
    """Pick (8,128)-aligned tiles of ~_TARGET_BLOCK_ELEMS f32 elements.

    Block shapes are multiples of (8, 128); they may overhang the array —
    Pallas masks the ragged edge blocks, so no host-side padding is needed.
    """
    if cols <= LANE:
        tile_cols = cols                       # full axis (allowed, tiny case)
    else:
        tile_cols = min(_round_up(cols, LANE), _MAX_TILE_COLS)
    tile_rows = max(SUBLANE,
                    (_TARGET_BLOCK_ELEMS // tile_cols) // SUBLANE * SUBLANE)
    tile_rows = min(tile_rows, _round_up(rows, SUBLANE))
    return tile_rows, tile_cols


def base_quantizer_forward(x_nchw, scale_c, zero_point_c):
    """Fake-quantize an NCHW activation with per-channel scale / zero_point.

    x_nchw:        (N, C, H, W)
    scale_c:       (C,) float32
    zero_point_c:  (C,) float32
    """
    N, C, H, W = x_nchw.shape
    rows, cols = N * C, H * W
    out_dtype = x_nchw.dtype

    tile_rows, tile_cols = _choose_tiles(rows, cols)

    # Pure-view reshape: NCHW -> (N*C, H*W); one (scale, zp) pair per row.
    x2d = x_nchw.reshape(rows, cols)

    # Single combined per-row parameter array: [:, 0] = scale, [:, 1] = zp.
    scale_rows = jnp.tile(scale_c.astype(jnp.float32), (N,))
    zp_rows = jnp.tile(zero_point_c.astype(jnp.float32), (N,))
    params = jnp.stack([scale_rows, zp_rows], axis=1)   # (rows, 2) f32

    grid = (pl.cdiv(rows, tile_rows), pl.cdiv(cols, tile_cols))

    out2d = pl.pallas_call(
        _fake_quant_kernel,
        out_shape=jax.ShapeDtypeStruct((rows, cols), out_dtype),
        grid_spec=pltpu.PrefetchScalarGridSpec(
            num_scalar_prefetch=0,
            grid=grid,
            in_specs=[
                pl.BlockSpec((tile_rows, tile_cols), lambda i, j: (i, j)),
                pl.BlockSpec((tile_rows, 2), lambda i, j: (i, 0)),
            ],
            out_specs=pl.BlockSpec((tile_rows, tile_cols), lambda i, j: (i, j)),
        ),
        compiler_params=pltpu.CompilerParams(
            dimension_semantics=("parallel", "parallel")),
    )(x2d, params)

    return out2d.reshape(N, C, H, W)


def _reference(x_nchw, scale_c, zero_point_c):
    s = scale_c.reshape(1, -1, 1, 1)
    z = zero_point_c.reshape(1, -1, 1, 1)
    q = jnp.clip(jnp.round(x_nchw / s + z), QMIN, QMAX)
    return (q - z) * s


if __name__ == "__main__":
    key = jax.random.PRNGKey(0)
    k1, k2, k3 = jax.random.split(key, 3)

    N, C, H, W = 2, 4, 16, 16
    x = jax.random.normal(k1, (N, C, H, W), dtype=jnp.float32) * 3.0

    # Deterministic per-channel quantization parameters (as an observer would
    # have produced).  module_type='activation' -> range_shape = (1, -1, 1, 1).
    # TODO(synk): observer / update_quantization_params (calibration) is host-
    # side state, not part of forward(); params are supplied directly here.
    scale = 0.02 + 0.01 * jnp.arange(C, dtype=jnp.float32)          # (C,)
    zero_point = jnp.round(
        jax.random.uniform(k3, (C,), minval=100.0, maxval=156.0)
    ).astype(jnp.float32)                                            # (C,)

    out = base_quantizer_forward(x, scale, zero_point)
    out = jax.block_until_ready(out)

    ref = _reference(x, scale, zero_point)
    assert out.shape == (N, C, H, W)
    assert jnp.allclose(out, ref, atol=1e-5, rtol=1e-5), "mismatch vs reference"

    print("KERNEL_OK")
</pallas_src>

<mosaic_0001>
module attributes {stable_mosaic.version = 11 : i64} {
  func.func @_fake_quant_kernel(%arg0: i32, %arg1: i32, %arg2: memref<8x256xf32, #tpu.memory_space<vmem>>, %arg3: memref<8x2xf32, #tpu.memory_space<vmem>>, %arg4: memref<8x256xf32, #tpu.memory_space<vmem>>) attributes {dimension_semantics = [#tpu.dimension_semantics<parallel>, #tpu.dimension_semantics<parallel>], iteration_bounds = array<i64: 1, 1>, scalar_prefetch = 0 : i64, scratch_operands = 0 : i64, tpu.core_type = #tpu.core_type<tc>, window_params = [{transform_indices = @transform_0, window_bounds = array<i64: 8, 256>}, {transform_indices = @transform_1, window_bounds = array<i64: 8, 2>}, {transform_indices = @transform_2, window_bounds = array<i64: 8, 256>}]} {
    %c0 = arith.constant 0 : index
    %c0_0 = arith.constant 0 : index
    %0 = vector.load %arg2[%c0, %c0_0] : memref<8x256xf32, #tpu.memory_space<vmem>>, vector<8x256xf32>
    %c0_1 = arith.constant 0 : index
    %c0_2 = arith.constant 0 : index
    %1 = vector.load %arg3[%c0_1, %c0_2] : memref<8x2xf32, #tpu.memory_space<vmem>>, vector<8x1xf32>
    %c0_3 = arith.constant 0 : index
    %c1 = arith.constant 1 : index
    %2 = vector.load %arg3[%c0_3, %c1] : memref<8x2xf32, #tpu.memory_space<vmem>>, vector<8x1xf32>
    %3 = vector.broadcast %1 : vector<8x1xf32> to vector<8x256xf32>
    %4 = arith.divf %0, %3 : vector<8x256xf32>
    %5 = vector.broadcast %2 : vector<8x1xf32> to vector<8x256xf32>
    %6 = arith.addf %4, %5 : vector<8x256xf32>
    %7 = math.roundeven %6 : vector<8x256xf32>
    %cst = arith.constant 0.000000e+00 : f32
    %cst_4 = arith.constant 2.550000e+02 : f32
    %8 = vector.broadcast %cst : f32 to vector<8x256xf32>
    %9 = arith.maximumf %8, %7 : vector<8x256xf32>
    %10 = vector.broadcast %cst_4 : f32 to vector<8x256xf32>
    %11 = arith.minimumf %10, %9 : vector<8x256xf32>
    %12 = vector.broadcast %2 : vector<8x1xf32> to vector<8x256xf32>
    %13 = arith.subf %11, %12 : vector<8x256xf32>
    %14 = vector.broadcast %1 : vector<8x1xf32> to vector<8x256xf32>
    %15 = arith.mulf %13, %14 : vector<8x256xf32>
    %c0_5 = arith.constant 0 : index
    %c0_6 = arith.constant 0 : index
    %16 = vector.load %arg4[%c0_5, %c0_6] : memref<8x256xf32, #tpu.memory_space<vmem>>, vector<8x256xf32>
    tpu.vector_store %arg4[%c0_5, %c0_6], %15 {strides = array<i32>} : memref<8x256xf32, #tpu.memory_space<vmem>>, vector<8x256xf32>,
    return
  }
  func.func @transform_0(%arg0: i32, %arg1: i32) -> (i32, i32) {
    %c0_i32 = arith.constant 0 : i32
    return %arg0, %arg1 : i32, i32
  }
  func.func @transform_1(%arg0: i32, %arg1: i32) -> (i32, i32) {
    %c0_i32 = arith.constant 0 : i32
    %c0_i32_0 = arith.constant 0 : i32
    return %arg0, %c0_i32 : i32, i32
  }
  func.func @transform_2(%arg0: i32, %arg1: i32) -> (i32, i32) {
    %c0_i32 = arith.constant 0 : i32
    return %arg0, %arg1 : i32, i32
  }
}

</mosaic_0001>

<bundles_post_ra>
// kernel: tpu_custom_call.1
= control target key start
LH: loop header
LB: loop body
LE: loop exit
PB: predicated region body
PF: predicated region fallthrough
CT: control target
= control target key end

     0   :  { %7 = vsyncpa [#allocation3], 0  ;;  %s189_s0 = inlined_call_operand.hbm [shape: f32[8,256], index: 0, kind: input, shape index: {}]   ;;  %s190_s1 = inlined_call_operand.vmem [shape: f32[8,2], index: 1, kind: input, shape index: {}]   ;;  %s191_s2 = inlined_call_operand.hbm [shape: f32[8,256], index: 2, kind: output, shape index: {}]  }
   0x1   :  { %8 = vsyncpa [#allocation4], 0  ;;  %s14_s11 = sshll.u32 %s189_s0, 4  ;;  %s161_s12 = smov [#allocation2]   ;;  %s15_s11 = int_to_ptr.hbm [resolvable:$true] %s14_s11 }
   0x2   :  { %s16_s13 = sshll.u32 %s161_s12, 4  ;;  %s17_s13 = int_to_ptr.vmem [resolvable:$true] %s16_s13 }
   0x3   :  { %19 = dma.hbm_to_vmem [thread:$0]  %s15_s11, 256, %s17_s13, [#allocation3]  }
   0x4   :  { %157 = dma.done.wait [#allocation3], 256  }
   0x5   :  { %158 = vsyncadd [#allocation3], 4294967040  ;;  %v162_v0 = vmov 0   ;;  %v28_v1 = vld [vmem:[%s190_s1] sm:$0xff]  ;;  %v163_v2 = vmov 1   ;;  %v27_v13 = vld [vmem:[#allocation2 + $0x8] sm:$0xff] }
   0x6   :  { %105 = vset.pattern.permute.xlu0 %v162_v0  ;;  %v26_v12 = vld [vmem:[#allocation2] sm:$0xff]  ;;  %s164_s0 = smov [#allocation5]   ;;  %s75_s18 = sshll.u32 %s191_s2, 4  ;;  %s76_s18 = int_to_ptr.hbm [resolvable:$true] %s75_s18 }
   0x7   :  { %31 = vperm.xlu0 %105, %v28_v1   ;;  %s73_s1 = sshll.u32 %s164_s0, 4  ;;  %s74_s1 = int_to_ptr.vmem [resolvable:$true] %s73_s1 }
   0xf   :  { %106 = vset.pattern.permute.xlu0 %v163_v2 }
  0x10   :  { %51 = vperm.xlu0 %106, %v28_v1  }
  0x79   :  { %v32_v3 = vpop.permute.xlu0 %31 }
  0x7a   :  { %107 = vrcp.f32 %v32_v3  ;;  %v45_v7 = vand.u32 2147483648, %v32_v3  ;;  %v43_v9 = vand.u32 2147483647, %v32_v3  ;;  %vm39_vm1 = vweird.f32 %v32_v3 }
  0x7c   :  { %v46_v11 = vor.u32 1.1754944e-38, %v45_v7  ;;  %vm44_vm3 = vcmp.eq.f32.partialorder %v43_v9, 8.507059e+37 }
  0x80   :  { %v108_v4 = vpop.eup %107 }
  0x81   :  { %v35_v5 = vmul.f32 %v108_v4, %v32_v3  ;;  %vm40_vm0 = vweird.f32 %v108_v4 }
  0x82   :  { %vm41_vm2 = vmor %vm39_vm1, %vm40_vm0  ;;  %v52_v16 = vpop.permute.xlu0 %51 }
  0x83   :  { %v36_v6 = vsub.f32 1.0, %v35_v5 }
  0x85   :  { %v37_v8 = vmul.f32 %v108_v4, %v36_v6 }
  0x87   :  { %v38_v10 = vadd.f32 %v108_v4, %v37_v8 }
  0x89   :  { %v42_v14 = vsel %vm41_vm2, %v108_v4, %v38_v10 }
  0x8a   :  { %v47_v15 = vsel %vm44_vm3, %v46_v11, %v42_v14 }
  0x8b   :  { %v48_v17 = vmul.f32 %v47_v15, %v26_v12  ;;  %v49_v18 = vmul.f32 %v47_v15, %v27_v13 }
  0x8d   :  { %v54_v19 = vadd.f32 %v52_v16, %v48_v17  ;;  %v55_v20 = vadd.f32 %v52_v16, %v49_v18 }
  0x8f   :  { %v87_v21 = vcvt.f32.s32 %v54_v19  ;;  %v95_v22 = vcvt.f32.s32 %v55_v20  ;;  %v85_v24 = vand.u32 2147483647, %v54_v19  ;;  %v90_v27 = vand.u32 2147483648, %v54_v19 }
  0x90   :  { %v93_v28 = vand.u32 2147483647, %v55_v20  ;;  %v98_v30 = vand.u32 2147483648, %v55_v20 }
  0x91   :  { %v88_v23 = vcvt.s32.f32 %v87_v21  ;;  %v96_v25 = vcvt.s32.f32 %v95_v22  ;;  %vm86_vm4 = vcmp.lt.f32.partialorder %v85_v24, 8388608.0 }
  0x92   :  { %vm94_vm5 = vcmp.lt.f32.partialorder %v93_v28, 8388608.0 }
  0x93   :  { %v89_v26 = vand.u32 2147483647, %v88_v23  ;;  %v97_v29 = vand.u32 2147483647, %v96_v25 }
  0x95   :  { %v91_v31 = vor.u32 %v90_v27, %v89_v26  ;;  %v99_v32 = vor.u32 %v98_v30, %v97_v29 }
  0x97   :  { %v92_v33 = vsel %vm86_vm4, %v91_v31, %v54_v19  ;;  %v100_v34 = vsel %vm94_vm5, %v99_v32, %v55_v20 }
  0x98   :  { %v58_v35 = vmax.f32 %v92_v33, 0.0  ;;  %v59_v36 = vmax.f32 %v100_v34, 0.0 }
  0x9a   :  { %v60_v37 = vmin.f32 %v58_v35, 255.0  ;;  %v61_v38 = vmin.f32 %v59_v36, 255.0 }
  0x9c   :  { %v62_v39 = vsub.f32 %v60_v37, %v52_v16  ;;  %v63_v40 = vsub.f32 %v61_v38, %v52_v16 }
  0x9e   :  { %v64_v41 = vmul.f32 %v62_v39, %v32_v3  ;;  %v65_v42 = vmul.f32 %v63_v40, %v32_v3 }
  0xa0   :  { %66 = vst [vmem:[#allocation5] sm:$0xff] %v64_v41 }
  0xa1   :  { %67 = vst [vmem:[#allocation5 + $0x8] sm:$0xff] %v65_v42 }
  0xa2   :  { %78 = dma.vmem_to_hbm [thread:$0]  %s74_s1, 256, %s76_s18, [#allocation4]  }
  0xa3   :  { %159 = dma.done.wait [#allocation4], 256  }
  0xa4   :  { %160 = vsyncadd [#allocation4], 4294967040 }
  0xa5   :  { %83 = vsyncpa [#allocation3], 1 }
  0xa6   :  { %84 = vsyncpa [#allocation4], 1 }

</bundles_post_ra>
